<compile_context>
chip_gen: v7x
topology: tpu7x:2x2x1
jax: 0.10.0
libtpu: 0.0.40
codegen_flags: <defaults>
</compile_context>

<pallas_src>
import jax
import jax.numpy as jnp
from jax.experimental import pallas as pl
from jax.experimental.pallas import tpu as pltpu

# ----- model dims (from the PyTorch module) -----
D_IN, D_H1, D_H2, D_H3, D_OUT = 196, 98, 49, 10, 1


def _round_up(n, m):
    return ((n + m - 1) // m) * m


def mlp_kernel(x_ref,
               w1_ref, b1_ref,
               w2_ref, b2_ref,
               w3_ref, b3_ref,
               w4_ref, b4_ref,
               o_ref):
    x = x_ref[...]                                                  # (TB, 196) bf16

    # hl_1: Linear(196 -> 98) [+ Dropout = identity at eval] + ReLU
    # bf16 @ bf16 on the MXU, f32 accumulate; bias/ReLU in f32.
    h1 = jnp.dot(x, w1_ref[...], preferred_element_type=jnp.float32) + b1_ref[...]
    h1 = jnp.maximum(h1, 0.0)

    # hl_2: Linear(98 -> 49) + ReLU (cast activation to bf16 only as MXU feed)
    h2 = jnp.dot(h1.astype(jnp.bfloat16), w2_ref[...],
                 preferred_element_type=jnp.float32) + b2_ref[...]
    h2 = jnp.maximum(h2, 0.0)

    # hl_3: Linear(49 -> 10) + ReLU
    h3 = jnp.dot(h2.astype(jnp.bfloat16), w3_ref[...],
                 preferred_element_type=jnp.float32) + b3_ref[...]
    h3 = jnp.maximum(h3, 0.0)

    # cl: Linear(10 -> 1).  K=10, N=1 is a degenerate matmul -> do it on the
    # VPU (broadcast multiply against the (1, 10) weight row) + XLU lane
    # reduce, saving an MXU push/pop per grid step.
    out = jnp.sum(h3 * w4_ref[...], axis=-1, keepdims=True) + b4_ref[...]
    o_ref[...] = out.astype(o_ref.dtype)

    # TODO(synk): training-mode dropout (0.1/0.1/0.3) would need pltpu.prng_*;
    # eval-mode forward (dropout == identity) is implemented here.


def mlp_forward(x, params, *, tile_b=1024):
    """x: (B, 196) float.  params: w1..w3 as (in, out), w4 as (1, 10), b* as (1, out)."""
    B = x.shape[0]

    # Batch tile: big tiles amortize the per-grid-step fixed overhead; cap so
    # the grid keeps >= 2 steps when B allows it (v7x megacore sharding).
    # Multiple of 16 keeps bf16 sublane packing clean.
    tb = min(tile_b, max(16, _round_up(pl.cdiv(B, 2), 16)))
    b_pad = _round_up(B, tb)
    if b_pad != B:
        x = jnp.pad(x, ((0, b_pad - B), (0, 0)))

    # bf16 for the streamed input and the MXU weights; f32 for biases and the
    # final VPU weight row.
    x_bf = x.astype(jnp.bfloat16)
    w1 = params["w1"].astype(jnp.bfloat16)
    w2 = params["w2"].astype(jnp.bfloat16)
    w3 = params["w3"].astype(jnp.bfloat16)
    w4 = params["w4"].astype(jnp.float32)            # (1, 10) row, used on VPU
    b1 = params["b1"].astype(jnp.float32)
    b2 = params["b2"].astype(jnp.float32)
    b3 = params["b3"].astype(jnp.float32)
    b4 = params["b4"].astype(jnp.float32)

    # Weights/biases (~60 KB total) use constant index_maps, so Pallas keeps
    # them VMEM-resident across all grid steps (no per-step re-DMA).
    full = lambda arr: pl.BlockSpec(arr.shape, lambda i: (0, 0))

    out = pl.pallas_call(
        mlp_kernel,
        out_shape=jax.ShapeDtypeStruct((b_pad, D_OUT), jnp.float32),
        grid_spec=pltpu.PrefetchScalarGridSpec(
            num_scalar_prefetch=0,
            grid=(b_pad // tb,),
            in_specs=[
                pl.BlockSpec((tb, D_IN), lambda i: (i, 0)),   # streamed x tile
                full(w1), full(b1),
                full(w2), full(b2),
                full(w3), full(b3),
                full(w4), full(b4),
            ],
            out_specs=pl.BlockSpec((tb, D_OUT), lambda i: (i, 0)),
        ),
        compiler_params=pltpu.CompilerParams(
            dimension_semantics=("parallel",),
            vmem_limit_bytes=48 << 20,   # headroom for tile_b >= 4096; safe on v7x's 64 MiB
        ),
    )(x_bf, w1, b1, w2, b2, w3, b3, w4, b4)

    return out[:B]


def init_params(key):
    """Deterministic synthetic init.

    w1..w3 stored as (in, out) so the kernel computes x @ W; w4 kept as the
    PyTorch (out=1, in=10) row so the VPU reduce uses it directly; biases (1, out).
    """
    ks = jax.random.split(key, 8)

    def lin(kw, kb, din, dout, *, row=False):
        scale = 1.0 / jnp.sqrt(jnp.float32(din))
        shape = (dout, din) if row else (din, dout)
        w = jax.random.uniform(kw, shape, jnp.float32, -scale, scale)
        b = jax.random.uniform(kb, (1, dout), jnp.float32, -scale, scale)
        return w, b

    w1, b1 = lin(ks[0], ks[1], D_IN, D_H1)
    w2, b2 = lin(ks[2], ks[3], D_H1, D_H2)
    w3, b3 = lin(ks[4], ks[5], D_H2, D_H3)
    w4, b4 = lin(ks[6], ks[7], D_H3, D_OUT, row=True)   # (1, 10)
    return dict(w1=w1, b1=b1, w2=w2, b2=b2, w3=w3, b3=b3, w4=w4, b4=b4)


def reference_forward(x, p):
    h1 = jnp.maximum(x @ p["w1"] + p["b1"], 0.0)
    h2 = jnp.maximum(h1 @ p["w2"] + p["b2"], 0.0)
    h3 = jnp.maximum(h2 @ p["w3"] + p["b3"], 0.0)
    return h3 @ p["w4"].T + p["b4"]


if __name__ == "__main__":
    key = jax.random.PRNGKey(0)
    k_x, k_p = jax.random.split(key)

    B = 32                                   # small test batch; tiles to (16, 196) x 2 steps
    x = jax.random.normal(k_x, (B, D_IN), jnp.float32)
    params = init_params(k_p)

    out = jax.block_until_ready(mlp_forward(x, params))
    ref = reference_forward(x, params)

    assert out.shape == (B, D_OUT)
    # bf16 inputs/weights inside the kernel -> looser tolerance vs f32 reference.
    assert jnp.allclose(out, ref, atol=5e-2, rtol=5e-2), "mismatch vs reference"

    print("KERNEL_OK")
</pallas_src>

<mosaic_0001>
module attributes {stable_mosaic.version = 11 : i64} {
  func.func @mlp_kernel(%arg0: i32, %arg1: memref<16x196xbf16, #tpu.memory_space<vmem>>, %arg2: memref<196x98xbf16, #tpu.memory_space<vmem>>, %arg3: memref<1x98xf32, #tpu.memory_space<vmem>>, %arg4: memref<98x49xbf16, #tpu.memory_space<vmem>>, %arg5: memref<1x49xf32, #tpu.memory_space<vmem>>, %arg6: memref<49x10xbf16, #tpu.memory_space<vmem>>, %arg7: memref<1x10xf32, #tpu.memory_space<vmem>>, %arg8: memref<1x10xf32, #tpu.memory_space<vmem>>, %arg9: memref<1x1xf32, #tpu.memory_space<vmem>>, %arg10: memref<16x1xf32, #tpu.memory_space<vmem>>) attributes {dimension_semantics = [#tpu.dimension_semantics<parallel>], iteration_bounds = array<i64: 2>, scalar_prefetch = 0 : i64, scratch_operands = 0 : i64, tpu.core_type = #tpu.core_type<tc>, window_params = [{transform_indices = @transform_0, window_bounds = array<i64: 16, 196>}, {pipeline_mode = #tpu.pipeline_mode<synchronous>, transform_indices = @transform_1, window_bounds = array<i64: 196, 98>}, {pipeline_mode = #tpu.pipeline_mode<synchronous>, transform_indices = @transform_2, window_bounds = array<i64: 1, 98>}, {pipeline_mode = #tpu.pipeline_mode<synchronous>, transform_indices = @transform_3, window_bounds = array<i64: 98, 49>}, {pipeline_mode = #tpu.pipeline_mode<synchronous>, transform_indices = @transform_4, window_bounds = array<i64: 1, 49>}, {pipeline_mode = #tpu.pipeline_mode<synchronous>, transform_indices = @transform_5, window_bounds = array<i64: 49, 10>}, {pipeline_mode = #tpu.pipeline_mode<synchronous>, transform_indices = @transform_6, window_bounds = array<i64: 1, 10>}, {pipeline_mode = #tpu.pipeline_mode<synchronous>, transform_indices = @transform_7, window_bounds = array<i64: 1, 10>}, {pipeline_mode = #tpu.pipeline_mode<synchronous>, transform_indices = @transform_8, window_bounds = array<i64: 1, 1>}, {transform_indices = @transform_9, window_bounds = array<i64: 16, 1>}]} {
    %c0 = arith.constant 0 : index
    %c0_0 = arith.constant 0 : index
    %0 = vector.load %arg1[%c0, %c0_0] : memref<16x196xbf16, #tpu.memory_space<vmem>>, vector<16x196xbf16>
    %c0_1 = arith.constant 0 : index
    %c0_2 = arith.constant 0 : index
    %1 = vector.load %arg2[%c0_1, %c0_2] : memref<196x98xbf16, #tpu.memory_space<vmem>>, vector<196x98xbf16>
    %cst = arith.constant dense<0.000000e+00> : vector<16x98xf32>
    %2 = tpu.matmul %0, %1, %cst {dimension_numbers = #tpu.dot_dimension_numbers<[1], [0], [0], [1], [0, 0, 1, 1], [], []>} : vector<16x196xbf16>, vector<196x98xbf16>, vector<16x98xf32> -> vector<16x98xf32>
    %c0_3 = arith.constant 0 : index
    %c0_4 = arith.constant 0 : index
    %3 = vector.load %arg3[%c0_3, %c0_4] : memref<1x98xf32, #tpu.memory_space<vmem>>, vector<1x98xf32>
    %4 = vector.broadcast %3 : vector<1x98xf32> to vector<16x98xf32>
    %5 = arith.addf %2, %4 : vector<16x98xf32>
    %cst_5 = arith.constant 0.000000e+00 : f32
    %6 = vector.broadcast %cst_5 : f32 to vector<16x98xf32>
    %7 = arith.maximumf %5, %6 : vector<16x98xf32>
    %8 = arith.truncf %7 : vector<16x98xf32> to vector<16x98xbf16>
    %c0_6 = arith.constant 0 : index
    %c0_7 = arith.constant 0 : index
    %9 = vector.load %arg4[%c0_6, %c0_7] : memref<98x49xbf16, #tpu.memory_space<vmem>>, vector<98x49xbf16>
    %cst_8 = arith.constant dense<0.000000e+00> : vector<16x49xf32>
    %10 = tpu.matmul %8, %9, %cst_8 {dimension_numbers = #tpu.dot_dimension_numbers<[1], [0], [0], [1], [0, 0, 1, 1], [], []>} : vector<16x98xbf16>, vector<98x49xbf16>, vector<16x49xf32> -> vector<16x49xf32>
    %c0_9 = arith.constant 0 : index
    %c0_10 = arith.constant 0 : index
    %11 = vector.load %arg5[%c0_9, %c0_10] : memref<1x49xf32, #tpu.memory_space<vmem>>, vector<1x49xf32>
    %12 = vector.broadcast %11 : vector<1x49xf32> to vector<16x49xf32>
    %13 = arith.addf %10, %12 : vector<16x49xf32>
    %cst_11 = arith.constant 0.000000e+00 : f32
    %14 = vector.broadcast %cst_11 : f32 to vector<16x49xf32>
    %15 = arith.maximumf %13, %14 : vector<16x49xf32>
    %16 = arith.truncf %15 : vector<16x49xf32> to vector<16x49xbf16>
    %c0_12 = arith.constant 0 : index
    %c0_13 = arith.constant 0 : index
    %17 = vector.load %arg6[%c0_12, %c0_13] : memref<49x10xbf16, #tpu.memory_space<vmem>>, vector<49x10xbf16>
    %cst_14 = arith.constant dense<0.000000e+00> : vector<16x10xf32>
    %18 = tpu.matmul %16, %17, %cst_14 {dimension_numbers = #tpu.dot_dimension_numbers<[1], [0], [0], [1], [0, 0, 1, 1], [], []>} : vector<16x49xbf16>, vector<49x10xbf16>, vector<16x10xf32> -> vector<16x10xf32>
    %c0_15 = arith.constant 0 : index
    %c0_16 = arith.constant 0 : index
    %19 = vector.load %arg7[%c0_15, %c0_16] : memref<1x10xf32, #tpu.memory_space<vmem>>, vector<1x10xf32>
    %20 = vector.broadcast %19 : vector<1x10xf32> to vector<16x10xf32>
    %21 = arith.addf %18, %20 : vector<16x10xf32>
    %cst_17 = arith.constant 0.000000e+00 : f32
    %22 = vector.broadcast %cst_17 : f32 to vector<16x10xf32>
    %23 = arith.maximumf %21, %22 : vector<16x10xf32>
    %c0_18 = arith.constant 0 : index
    %c0_19 = arith.constant 0 : index
    %24 = vector.load %arg8[%c0_18, %c0_19] : memref<1x10xf32, #tpu.memory_space<vmem>>, vector<1x10xf32>
    %25 = vector.broadcast %24 : vector<1x10xf32> to vector<16x10xf32>
    %26 = arith.mulf %23, %25 : vector<16x10xf32>
    %cst_20 = arith.constant dense<0.000000e+00> : vector<16xf32>
    %27 = vector.multi_reduction <add>, %26, %cst_20 [1] : vector<16x10xf32> to vector<16xf32>
    %28 = vector.shape_cast %27 : vector<16xf32> to vector<16x1xf32>
    %c0_21 = arith.constant 0 : index
    %c0_22 = arith.constant 0 : index
    %29 = vector.load %arg9[%c0_21, %c0_22] : memref<1x1xf32, #tpu.memory_space<vmem>>, vector<1x1xf32>
    %30 = vector.broadcast %29 : vector<1x1xf32> to vector<16x1xf32>
    %31 = arith.addf %28, %30 : vector<16x1xf32>
    %c0_23 = arith.constant 0 : index
    %c0_24 = arith.constant 0 : index
    %32 = vector.load %arg10[%c0_23, %c0_24] : memref<16x1xf32, #tpu.memory_space<vmem>>, vector<16x1xf32>
    tpu.vector_store %arg10[%c0_23, %c0_24], %31 {strides = array<i32>} : memref<16x1xf32, #tpu.memory_space<vmem>>, vector<16x1xf32>,
    return
  }
  func.func @transform_0(%arg0: i32) -> (i32, i32) {
    %c0_i32 = arith.constant 0 : i32
    %c0_i32_0 = arith.constant 0 : i32
    return %arg0, %c0_i32 : i32, i32
  }
  func.func @transform_1(%arg0: i32) -> (i32, i32) {
    %c0_i32 = arith.constant 0 : i32
    %c0_i32_0 = arith.constant 0 : i32
    %c0_i32_1 = arith.constant 0 : i32
    return %c0_i32, %c0_i32_0 : i32, i32
  }
  func.func @transform_2(%arg0: i32) -> (i32, i32) {
    %c0_i32 = arith.constant 0 : i32
    %c0_i32_0 = arith.constant 0 : i32
    %c0_i32_1 = arith.constant 0 : i32
    return %c0_i32, %c0_i32_0 : i32, i32
  }
  func.func @transform_3(%arg0: i32) -> (i32, i32) {
    %c0_i32 = arith.constant 0 : i32
    %c0_i32_0 = arith.constant 0 : i32
    %c0_i32_1 = arith.constant 0 : i32
    return %c0_i32, %c0_i32_0 : i32, i32
  }
  func.func @transform_4(%arg0: i32) -> (i32, i32) {
    %c0_i32 = arith.constant 0 : i32
    %c0_i32_0 = arith.constant 0 : i32
    %c0_i32_1 = arith.constant 0 : i32
    return %c0_i32, %c0_i32_0 : i32, i32
  }
  func.func @transform_5(%arg0: i32) -> (i32, i32) {
    %c0_i32 = arith.constant 0 : i32
    %c0_i32_0 = arith.constant 0 : i32
    %c0_i32_1 = arith.constant 0 : i32
    return %c0_i32, %c0_i32_0 : i32, i32
  }
  func.func @transform_6(%arg0: i32) -> (i32, i32) {
    %c0_i32 = arith.constant 0 : i32
    %c0_i32_0 = arith.constant 0 : i32
    %c0_i32_1 = arith.constant 0 : i32
    return %c0_i32, %c0_i32_0 : i32, i32
  }
  func.func @transform_7(%arg0: i32) -> (i32, i32) {
    %c0_i32 = arith.constant 0 : i32
    %c0_i32_0 = arith.constant 0 : i32
    %c0_i32_1 = arith.constant 0 : i32
    return %c0_i32, %c0_i32_0 : i32, i32
  }
  func.func @transform_8(%arg0: i32) -> (i32, i32) {
    %c0_i32 = arith.constant 0 : i32
    %c0_i32_0 = arith.constant 0 : i32
    %c0_i32_1 = arith.constant 0 : i32
    return %c0_i32, %c0_i32_0 : i32, i32
  }
  func.func @transform_9(%arg0: i32) -> (i32, i32) {
    %c0_i32 = arith.constant 0 : i32
    %c0_i32_0 = arith.constant 0 : i32
    return %arg0, %c0_i32 : i32, i32
  }
}

</mosaic_0001>

<bundles_post_ra>
// kernel: tpu_custom_call.1
= control target key start
LH: loop header
LB: loop body
LE: loop exit
PB: predicated region body
PF: predicated region fallthrough
CT: control target
= control target key end

     0   :  { %s1340_s0 = inlined_call_operand.hbm [shape: bf16[32,196], index: 0, kind: input, shape index: {}]   ;;  %s1341_s1 = inlined_call_operand.vmem [shape: bf16[196,98], index: 1, kind: input, shape index: {}]   ;;  %s1342_s2 = inlined_call_operand.vmem [shape: f32[1,98], index: 2, kind: input, shape index: {}]   ;;  %s1343_s3 = inlined_call_operand.vmem [shape: bf16[98,49], index: 3, kind: input, shape index: {}]   ;;  %s1344_s4 = inlined_call_operand.vmem [shape: f32[1,49], index: 4, kind: input, shape index: {}]   ;;  %s1345_s5 = inlined_call_operand.vmem [shape: bf16[49,10], index: 5, kind: input, shape index: {}]   ;;  %s1346_s6 = inlined_call_operand.vmem [shape: f32[1,10], index: 6, kind: input, shape index: {}]   ;;  %s1347_s7 = inlined_call_operand.vmem [shape: f32[1,10], index: 7, kind: input, shape index: {}]   ;;  %s1348_s8 = inlined_call_operand.<no memory space> [shape: f32[1,1], index: 8, kind: input, shape index: {}]   ;;  %s1349_s9 = inlined_call_operand.vmem [shape: f32[32,1], index: 9, kind: output, shape index: {}]  }
   0x1   :  { %v14_v0 = vstv %s1348_s8 }
   0x2   :  { %15 = vst [vmem:[#allocation2] sm:$0x1] %v14_v0 }
   0x3   :  { %16 = vsyncpa [#allocation4], 0 }
   0x4   :  { %18 = vsyncpa [#allocation4 + $0x1], 0  ;;  %s1111_s11 = smov 0   ;;  %s1113_s12 = smov 0  }
   0x5   :  { %s1115_s13 = smov 0   ;;  %s1117_s14 = smov 0  }
   0x6 LB: > { %s822_s8 = sadd.s32 4294967295, %s1050_s14   ;;  %s1131_s15 = sadd.s32 1, %s1050_s14   ;;  %s1050_s14 = sphi %s1117_s14, %s1356_s14   ;;  %s1046_s13 = sphi %s1115_s13, %s1355_s13   ;;  %s1042_s12 = sphi %s1113_s12, %s1354_s12   ;;  %s1038_s11 = sphi %s1111_s11, %s1353_s11  }
   0x7   : > { %s28_s16 = ssub.s32 %s1050_s14, %s1131_s15  ;;  %s31_s17 = sadd.s32 1, %s1046_s13 }
   0x8   : > { %p29_p0 = scmp.eq.s32.totalorder %s28_s16, 0  ;;  %p38_p1 = scmp.ne.s32.totalorder %s1046_s13, %s1042_s12 }
   0x9   : > { %p39_p2 = scmp.eq.s32.totalorder %s1050_s14, 0  ;;  %p44_p3 = scmp.ne.s32.totalorder %s1042_s12, %s1038_s11 }
   0xa   : > { %s1141_s18 = scalar_select %p29_p0, %s1046_s13, %s31_s17  }
   0xb   : > { %p40_p4 = por %p39_p2, %p38_p1  ;;  %p45_p5 = scmp.eq.s32.totalorder %s822_s8, 0 }
   0xc   : > { %p921_p6 = scmp.lt.s32.totalorder %s1050_s14, 2  ;;  %s286_s20 = sand.u32 1, %s1046_s13  }
   0xd   : > { %p1146_p7 = por %p45_p5, %p44_p3  ;;  %s826_s21 = sshll.u32 %s286_s20, 4 }
   0xe   : > { %s871_s22 = sshll.u32 %s1050_s14, 8  ;;  %s290_s26 = scalar_lea.vmem [#allocation3], %s826_s21 }
   0xf   : > { %s1155_s25 = scalar_lea.hbm %s1340_s0, %s871_s22  ;;  %s298_s27 = sshll.u32 %s290_s26, 4  ;;  %s1157_s27 = int_to_ptr.vmem [resolvable:$true] %s298_s27 }
  0x10   : > { %p1159_p8 = pnand %p921_p6, %p40_p4  ;;  %s1164_s29 = scalar_lea.sflag [#allocation4], %s286_s20 }
  0x11   : > { %s986_s30 = scalar_lea.hbm %s1155_s25, 256  ;;  %s991_s16 = scalar_lea.hbm %s1340_s0, 512 }
  0x12   : > { %p987_p10 = scmp.ne.s32.totalorder %s1155_s25, %s986_s30  ;;  %p988_p11 = pneg %p1159_p8 }
  0x13   : > { %p992_p0 = scmp.lt.u32.totalorder %s1155_s25, %s1340_s0  ;;  %p993_p1 = scmp.lt.u32.totalorder %s991_s16, %s986_s30 }
  0x14   : > { %p989_p12 = pnand %p988_p11, %p987_p10  ;;  %p995_p3 = scmp.lt.u32.totalorder %s986_s30, %s1155_s25 }
  0x15   : > { %p994_p2 = por %p993_p1, %p992_p0 }
  0x16   : > { %p990_p13 = pneg %p989_p12 }
  0x17   : > { %p996_p4 = por %p995_p3, %p994_p2 }
  0x19   : > { %p997_p5 = pnand %p996_p4, %p990_p13 }
  0x1b   : > { %1000 = shalt.err (!%p997_p5)
}
  0x1c   : > { %s1001_s20 = scalar_lea.vmem %s1157_s27, 256  ;;  %s1052_s22 = smov [#allocation3]  }
  0x1d   : > { %p1002_p6 = scmp.ne.s32.totalorder %s1157_s27, %s1001_s20  ;;  %s1006_s23 = sshll.u32 %s1052_s22, 4  ;;  %s1007_s23 = int_to_ptr.vmem [resolvable:$false] %s1006_s23 }
  0x1e   : > { %s1008_s24 = scalar_lea.vmem %s1007_s23, 512  ;;  %p1009_p9 = scmp.lt.s32.totalorder %s1157_s27, %s1007_s23 }
  0x1f   : > { %p1004_p10 = pnand %p1002_p6, %p988_p11  ;;  %p1010_p0 = scmp.lt.s32.totalorder %s1008_s24, %s1001_s20 }
  0x21   : > { %p1005_p12 = pneg %p1004_p10  ;;  %p1011_p1 = por %p1010_p0, %p1009_p9 }
  0x23   : > { %p1012_p2 = pnand %p1011_p1, %p1005_p12 }
  0x25   : > { %1015 = shalt.err (!%p1012_p2)
}
  0x26   : > { %s1053_s26 = smov 128   ;;  %s1054_s30 = smov 8  }
  0x27   : > { %920 = dma.hbm_to_vmem [thread:$0]  (!%p1159_p8), %s1155_s25, 256, %s1157_s27, %s1164_s29, %s1053_s26, %s1053_s26, %s1054_s30  }
  0x28   : > { %p306_p11 = scmp.lt.s32.totalorder %s1050_s14, 3  ;;  %p1352_p13 = scmp.ge.s32.totalorder %s1050_s14, 1 }
  0x2a   : > { %p307_p3 = pnand %p1352_p13, %p306_p11 }
  0x2b   : > { %s312_s10 = sand.u32 (!%p307_p3), 1, %s1042_s12  }
  0x2c   : > { %310 = sbr.rel (%p307_p3) target bundleno = 913 (0x391), region = 56  ;;  %s1196_s11 = sshll.u32 (!%p307_p3), %s312_s10, 4 }
  0x2d   : > { %s313_s16 = scalar_lea.sflag (!%p307_p3), [#allocation4], %s312_s10  ;;  %s316_s17 = scalar_lea.vmem (!%p307_p3), [#allocation3], %s1196_s11 }
  0x33   : > { %1033 = dma.done.wait (%p1146_p7), %s313_s16, 256  }
  0x34   : > { %1035 = vsyncadd (%p1146_p7), %s313_s16, 4294967040  ;;  %v1055_v1 = vmov 0   ;;  %v1056_v2 = vmov 0.0   ;;  %v959_v3 = vld [vmem:[%s1341_s1] sm:$0xff]   ;;  %v960_v4 = vld [vmem:[%s1341_s1 + $0x8] sm:$0xff]   ;;  %vm477_vm0 = vcmask 556032  }
  0x35   : > { %485 = vmatprep.subr.bf16.mxu0 %v1055_v1  ;;  %885 = vmatprep.subr.bf16.mxu1 %v1056_v2  ;;  %v961_v5 = vld [vmem:[%s1341_s1 + $0x10] sm:$0xff]   ;;  %v962_v6 = vld [vmem:[%s1341_s1 + $0x18] sm:$0xff]   ;;  %v963_v7 = vld [vmem:[%s1341_s1 + $0x20] sm:$0xff]   ;;  %vm481_vm1 = vcmask 1041408   ;;  %vm592_vm2 = vcmask 1040384   ;;  %vm1057_vm3 = vmmov 0  }
  0x36   : > { %486 = vmatpush1.bf16.msra.mxu0 %v959_v3  ;;  %v974_v8 = vld [vmem:[%s316_s17 + $0x4] ss:$8 sps:$4 sm:$0xff]   ;;  %v972_v23 = vld [vmem:[%s316_s17] ss:$8 sps:$4 sm:$0xff]   ;;  %899 = vmatprep.mubr.msk.bf16.mxu1 %vm1057_vm3, %v1056_v2  ;;  %vm588_vm4 = vcmask 801792   ;;  %v680_v40 = vsel %vm592_vm2, 65535, %v1055_v1 }
  0x37   : > { %487 = vmatprep.subr.bf16.mxu0 %v1055_v1  ;;  %v975_v9 = vld [vmem:[%s1343_s3] sm:$0xff]   ;;  %850 = vmatprep.mubr.msk.bf16.mxu0 %vm477_vm0, %v974_v8  ;;  %v976_v10 = vld [vmem:[%s1343_s3 + $0x8] sm:$0xff]   ;;  %v977_v12 = vld [vmem:[%s1343_s3 + $0x10] sm:$0xff]   ;;  %vm675_vm5 = vcmask 400384   ;;  %vm736_vm6 = vcmask 80896   ;;  %s832_s11 = sshll.u32 %s822_s8, 1 }
  0x38   : > { %886 = vmatpush3.bf16.msra.mxu1 %v975_v9  ;;  %v964_v11 = vld [vmem:[%s1341_s1 + $0x28] sm:$0xff]   ;;  %v965_v13 = vld [vmem:[%s1341_s1 + $0x30] sm:$0xff]   ;;  %v978_v14 = vld [vmem:[%s1343_s3 + $0x18] sm:$0xff]   ;;  %p353_p7 = scmp.lt.s32.totalorder %s832_s11, 3  ;;  %vm752_vm7 = vcmask 7168  }
  0x39   : > { %887 = vmatprep.subr.bf16.mxu1 %v1056_v2  ;;  %v966_v15 = vld [vmem:[%s1341_s1 + $0x38] sm:$0xff]   ;;  %v979_v16 = vld [vmem:[%s1343_s3 + $0x20] sm:$0xff]   ;;  %v968_v18 = vld [vmem:[%s1341_s1 + $0x48] sm:$0xff]  }
  0x3a   : > { %488 = vmatpush1.bf16.msra.mxu0 %v960_v4  ;;  %v967_v17 = vld [vmem:[%s1341_s1 + $0x40] sm:$0xff]   ;;  %v969_v19 = vld [vmem:[%s1341_s1 + $0x50] sm:$0xff]   ;;  %v970_v20 = vld [vmem:[%s1341_s1 + $0x58] sm:$0xff]   ;;  %s1358_s11 = smov (!%p353_p7, %s832_s11), 3 }
  0x3b   : > { %489 = vmatprep.subr.bf16.mxu0 %v1055_v1  ;;  %v971_v21 = vld [vmem:[%s1341_s1 + $0x60] ss:$0 sps:$4 sm:$0x33]   ;;  %v980_v24 = vld [vmem:[%s1343_s3 + $0x28] sm:$0xff]   ;;  %v985_v41 = vld [vmem:[%s1345_s5 + $0x10] sm:$0xff]   ;;  %s833_s17 = sshll.u32 %s1358_s11, 3 }
  0x3c   : > { %888 = vmatpush3.bf16.msra.mxu1 %v976_v10  ;;  %v483_v22 = vsel %vm481_vm1, %v971_v21, 0  ;;  %v981_v25 = vld [vmem:[%s1343_s3 + $0x30] ss:$0 sps:$4 sm:$0x11]   ;;  %v834_v27 = vld [vmem:[%s1342_s2] ss:$0 sm:$0xff]  ;;  %s356_s25 = scalar_lea.vmem %s1349_s9, %s833_s17 }
  0x3d   : > { %889 = vmatprep.subr.bf16.mxu1 %v1056_v2  ;;  %v594_v26 = vsel %vm592_vm2, %v981_v25, 0  ;;  %v983_v36 = vld [vmem:[%s1345_s5] sm:$0xff]   ;;  %v984_v38 = vld [vmem:[%s1345_s5 + $0x8] sm:$0xff]   ;;  %v982_v39 = vld [vmem:[%s1345_s5 + $0x18] ss:$0 sps:$4 sm:$0x11]  }
  0x3e   : > { %490 = vmatpush1.bf16.msra.mxu0 %v961_v5  ;;  %v682_v42 = vand.u32 %v982_v39, %v680_v40  ;;  %v851_v43 = vld [vmem:[%s1344_s4] ss:$0 sm:$0xff] }
  0x3f   : > { %491 = vmatprep.subr.bf16.mxu0 %v1055_v1  ;;  %v860_v53 = vld [vmem:[%s1346_s6] ss:$0 sm:$0xff] }
  0x40   : > { %890 = vmatpush3.bf16.msra.mxu1 %v977_v12  ;;  %v866_v58 = vld [vmem:[%s1347_s7] ss:$0 sm:$0xff] }
  0x41   : > { %891 = vmatprep.subr.bf16.mxu1 %v1056_v2  ;;  %v867_v3 = vld [vmem:[#allocation2] ss:$0 sm:$0xff] }
  0x42   : > { %492 = vmatpush1.bf16.msra.mxu0 %v962_v6 }
  0x43   : > { %493 = vmatprep.subr.bf16.mxu0 %v1055_v1 }
  0x44   : > { %892 = vmatpush3.bf16.msra.mxu1 %v978_v14 }
  0x45   : > { %893 = vmatprep.subr.bf16.mxu1 %v1056_v2 }
  0x46   : > { %494 = vmatpush1.bf16.msra.mxu0 %v963_v7 }
  0x47   : > { %495 = vmatprep.subr.bf16.mxu0 %v1055_v1 }
  0x48   : > { %894 = vmatpush3.bf16.msra.mxu1 %v979_v16 }
  0x49   : > { %895 = vmatprep.subr.bf16.mxu1 %v1056_v2 }
  0x4a   : > { %496 = vmatpush1.bf16.msra.mxu0 %v964_v11 }
  0x4b   : > { %497 = vmatprep.subr.bf16.mxu0 %v1055_v1 }
  0x4c   : > { %896 = vmatpush3.bf16.msra.mxu1 %v980_v24 }
  0x4d   : > { %897 = vmatprep.subr.bf16.mxu1 %v1056_v2 }
  0x4e   : > { %498 = vmatpush1.bf16.msra.mxu0 %v965_v13 }
  0x4f   : > { %499 = vmatprep.subr.bf16.mxu0 %v1055_v1 }
  0x50   : > { %898 = vmatpush3.bf16.msra.mxu1 %v594_v26 }
  0x51   : > { %903 = vmatprep.subr.bf16.mxu1 %v1056_v2 }
  0x52   : > { %500 = vmatpush1.bf16.msra.mxu0 %v966_v15 }
  0x53   : > { %501 = vmatprep.subr.bf16.mxu0 %v1055_v1 }
  0x56   : > { %502 = vmatpush1.bf16.msra.mxu0 %v967_v17 }
  0x57   : > { %503 = vmatprep.subr.bf16.mxu0 %v1055_v1 }
  0x5a   : > { %504 = vmatpush1.bf16.msra.mxu0 %v968_v18 }
  0x5b   : > { %505 = vmatprep.subr.bf16.mxu0 %v1055_v1 }
  0x5e   : > { %506 = vmatpush1.bf16.msra.mxu0 %v969_v19 }
  0x5f   : > { %507 = vmatprep.subr.bf16.mxu0 %v1055_v1 }
  0x62   : > { %508 = vmatpush1.bf16.msra.mxu0 %v970_v20 }
  0x63   : > { %509 = vmatprep.subr.bf16.mxu0 %v1055_v1 }
  0x66   : > { %510 = vmatpush1.bf16.msra.mxu0 %v483_v22 }
  0x69   : > { %518 = vmatmul.mubr.bf16.vlgmr.msra.gmra.mrb[0].mxu0 %v972_v23 }
 0x13c   : > { %v519_v28 = vpop.f32.mrb[0].mxu0 }
 0x13d   : > { %v520_v29 = vadd.f32 %v834_v27, %v519_v28  ;;  %v521_v30 = vpop.f32.mrb[1].mxu0 }
 0x13e   : > { %v522_v31 = vpop.f32.mrb[2].mxu0 }
 0x13f   : > { %v523_v32 = vadd.f32 %v834_v27, %v522_v31  ;;  %v524_v33 = vpop.f32.mrb[3].mxu0  ;;  %v526_v34 = vmax.f32 %v520_v29, 0.0 }
 0x141   : > { %v527_v35 = vmax.f32 %v523_v32, 0.0 }
 0x143   : > { %v528_v37 = vpack.c.bf16 %v527_v35, %v526_v34 }
 0x145   : > { %900 = vmatmul.mubr.msk.bf16.vlgmr.msra.gmra.mrb[0].mxu1 %vm588_vm4, %v528_v37 }
 0x146   : > { %904 = vmatpush3.bf16.msra.mxu1 %v983_v36  ;;  %911 = vmatprep.mubr.msk.bf16.mxu1 %vm1057_vm3, %v1056_v2 }
 0x147   : > { %905 = vmatprep.subr.bf16.mxu1 %v1056_v2 }
 0x14a   : > { %906 = vmatpush3.bf16.msra.mxu1 %v984_v38 }
 0x14b   : > { %907 = vmatprep.subr.bf16.mxu1 %v1056_v2 }
 0x14e   : > { %908 = vmatpush3.bf16.msra.mxu1 %v985_v41 }
 0x14f   : > { %909 = vmatprep.subr.bf16.mxu1 %v1056_v2 }
 0x152   : > { %910 = vmatpush3.bf16.msra.mxu1 %v682_v42 }
 0x218   : > { %v630_v44 = vpop.f32.mrb[0].mxu1 }
 0x219   : > { %v631_v45 = vadd.f32 %v851_v43, %v630_v44  ;;  %v901_v46 = vpop.f32.mrb[1].mxu1 }
 0x21a   : > { %v633_v47 = vpop.f32.mrb[2].mxu1 }
 0x21b   : > { %v634_v48 = vadd.f32 %v851_v43, %v633_v47  ;;  %v902_v49 = vpop.f32.mrb[3].mxu1  ;;  %v637_v50 = vmax.f32 %v631_v45, 0.0 }
 0x21d   : > { %v638_v51 = vmax.f32 %v634_v48, 0.0 }
 0x21f   : > { %v639_v52 = vpack.c.bf16 %v638_v51, %v637_v50 }
 0x221   : > { %912 = vmatmul.mubr.msk.bf16.vlgmr.msra.gmra.mrb[4].mxu1 %vm675_vm5, %v639_v52 }
 0x2f4   : > { %v718_v54 = vpop.f32.mrb[4].mxu1 }
 0x2f5   : > { %v719_v55 = vadd.f32 %v860_v53, %v718_v54  ;;  %v913_v56 = vpop.f32.mrb[5].mxu1 }
 0x2f6   : > { %v721_v57 = vpop.f32.mrb[6].mxu1 }
 0x2f7   : > { %v725_v59 = vmax.f32 %v719_v55, 0.0  ;;  %v722_v60 = vadd.f32 %v860_v53, %v721_v57  ;;  %v914_v61 = vpop.f32.mrb[7].mxu1 }
 0x2f9   : > { %v726_v62 = vmax.f32 %v722_v60, 0.0  ;;  %v734_v63 = vmul.f32 %v866_v58, %v725_v59 }
 0x2fb   : > { %v737_v0 = vsel %vm736_vm6, %v734_v63, 0.0  ;;  %v735_v1 = vmul.f32 %v866_v58, %v726_v62 }
 0x2fc   : > { %738 = vadd.xlane.f32.xlu0 %v737_v0 }
 0x2fd   : > { %v740_v2 = vsel %vm736_vm6, %v735_v1, 0.0 }
 0x300   : > { %741 = vadd.xlane.f32.xlu0 %v740_v2 }
 0x389   : > { %v739_v4 = vpop.xlane.xlu0 %738 }
 0x38a   : > { %v750_v5 = vadd.f32 %v867_v3, %v739_v4 }
 0x38c   : > { %753 = vst.msk [vmem:[%s356_s25] sm:$0xff] %vm752_vm7, %v750_v5 }
 0x38d   : > { %v742_v6 = vpop.xlane.xlu0 %741 }
 0x38e   : > { %v751_v7 = vadd.f32 %v867_v3, %v742_v6 }
 0x390   : > { %754 = vst.msk [vmem:[%s356_s25 + $0x8] sm:$0xff] %vm752_vm7, %v751_v7 }
 0x391 PF: > { %p21_p8 = scmp.ge.s32.totalorder %s1131_s15, 4   ;;  %s1353_s11 = smov %s1042_s12 }
 0x392   : > { %s1354_s12 = smov %s1046_s13  ;;  %s1355_s13 = smov %s1141_s18 }
 0x393   : > { %s1356_s14 = smov %s1131_s15  ;;  %23 = sbr.rel (!%p21_p8) target bundleno = 6 (0x6), region = 96 }
 0x39a   :  { %777 = vsyncpa [#allocation4], 1 }
 0x39b   :  { %779 = vsyncpa [#allocation4 + $0x1], 1 }

</bundles_post_ra>
